<compile_context>
chip_gen: v6e
topology: v6e:2x2x1
jax: 0.10.0
libtpu: 0.0.40
codegen_flags: <defaults>
</compile_context>

<pallas_src>
import functools

import jax
import jax.numpy as jnp
from jax.experimental import pallas as pl
from jax.experimental.pallas import tpu as pltpu


def _round_up(v, m):
    return (v + m - 1) // m * m


def policy_model_kernel(x_ref, w1_ref, b1_ref, wh_ref, bh_ref, out_ref, *,
                        action_size):
    # encoder: Linear (bf16 inputs, f32 MXU accumulate) + ReLU -> (TB, Dp) f32
    h = jnp.dot(x_ref[...], w1_ref[...], preferred_element_type=jnp.float32)
    h = jnp.maximum(h + b1_ref[...], 0.0)

    # fused [policy | Adv] heads: one lane-dense (Dp, Np) matmul, Np padded to 128
    head = jnp.dot(h.astype(jnp.bfloat16), wh_ref[...],
                   preferred_element_type=jnp.float32) + bh_ref[...]

    # softmax over the first `action_size` lanes only; lane `action_size` holds
    # Adv; remaining pad lanes are exactly zero (zero-padded weights/bias).
    lane = jax.lax.broadcasted_iota(jnp.int32, head.shape, 1)
    is_policy = lane < action_size
    logits = jnp.where(is_policy, head, -jnp.inf)
    m = jnp.max(logits, axis=-1, keepdims=True)
    e = jnp.exp(logits - m)                              # pad lanes -> exp(-inf) = 0
    denom = jnp.sum(e, axis=-1, keepdims=True)
    probs = e * pl.reciprocal(denom, approx=True)        # EUP slot, VALU stays free

    # lane-dense (TB, Np) output slab: [softmax(policy) | Adv | zeros]
    out_ref[...] = jnp.where(is_policy, probs, head)


def policy_model_forward(state, params, *, batch_tile=512):
    """state: (B, C, H, W). Returns (policy (B, A) f32, Adv (B,) f32)."""
    B = state.shape[0]
    x = state.reshape(B, -1)
    F_in = x.shape[1]
    D = params["w1"].shape[1]
    A = params["wp"].shape[1]

    # TPU-friendly padded shapes: lanes multiple of 128, sublanes of 16 (bf16)
    Fp = _round_up(F_in, 128)
    Dp = _round_up(D, 128)
    Np = _round_up(A + 1, 128)                 # fused [policy | Adv] head width
    TB = min(batch_tile, _round_up(B, 16))
    Bp = _round_up(_round_up(B, 16), TB)

    # bf16 storage (f32 accumulation in-kernel); heads fused + zero-padded.
    xp = jnp.zeros((Bp, Fp), jnp.bfloat16).at[:B, :F_in].set(x.astype(jnp.bfloat16))
    w1 = jnp.zeros((Fp, Dp), jnp.bfloat16).at[:F_in, :D].set(
        params["w1"].astype(jnp.bfloat16))
    b1 = jnp.zeros((1, Dp), jnp.float32).at[:, :D].set(
        params["b1"].astype(jnp.float32))
    wh = (jnp.zeros((Dp, Np), jnp.bfloat16)
          .at[:D, :A].set(params["wp"].astype(jnp.bfloat16))
          .at[:D, A:A + 1].set(params["wa"].astype(jnp.bfloat16)))
    bh = (jnp.zeros((1, Np), jnp.float32)
          .at[:, :A].set(params["bp"].astype(jnp.float32))
          .at[:, A:A + 1].set(params["ba"].astype(jnp.float32)))

    grid = (Bp // TB,)
    cost = pl.CostEstimate(
        flops=2 * Bp * (Fp * Dp + Dp * Np),
        transcendentals=Bp * Np,
        bytes_accessed=(xp.size * 2 + w1.size * 2 + b1.size * 4
                        + wh.size * 2 + bh.size * 4 + Bp * Np * 4),
    )

    out = pl.pallas_call(
        functools.partial(policy_model_kernel, action_size=A),
        out_shape=jax.ShapeDtypeStruct((Bp, Np), jnp.float32),
        grid=grid,
        in_specs=[
            pl.BlockSpec((TB, Fp), lambda i: (i, 0)),   # activations: batch-tiled
            pl.BlockSpec((Fp, Dp), lambda i: (0, 0)),   # weights: VMEM-resident
            pl.BlockSpec((1, Dp), lambda i: (0, 0)),
            pl.BlockSpec((Dp, Np), lambda i: (0, 0)),
            pl.BlockSpec((1, Np), lambda i: (0, 0)),
        ],
        out_specs=pl.BlockSpec((TB, Np), lambda i: (i, 0)),
        compiler_params=pltpu.CompilerParams(
            dimension_semantics=("parallel",)),         # v7x: 2 TCs split row tiles
        cost_estimate=cost,
    )(xp, w1, b1, wh, bh)

    policy = out[:B, :A]
    adv = out[:B, A]
    return policy, adv


def init_params(key, dense_in, dense_size, action_size):
    """Deterministic PyTorch-Linear-style init (uniform +-1/sqrt(fan_in))."""
    ks = jax.random.split(key, 6)

    def lin(kw, kb, fan_in, fan_out):
        bound = 1.0 / jnp.sqrt(float(fan_in))
        w = jax.random.uniform(kw, (fan_in, fan_out), jnp.float32, -bound, bound)
        b = jax.random.uniform(kb, (1, fan_out), jnp.float32, -bound, bound)
        return w, b

    w1, b1 = lin(ks[0], ks[1], dense_in, dense_size)
    wp, bp = lin(ks[2], ks[3], dense_size, action_size)
    wa, ba = lin(ks[4], ks[5], dense_size, 1)
    return {"w1": w1, "b1": b1, "wp": wp, "bp": bp, "wa": wa, "ba": ba}


def reference_forward_f32(state, params):
    """Pure-f32 JAX reference mirroring the PyTorch forward()."""
    B = state.shape[0]
    x = state.reshape(B, -1).astype(jnp.float32)
    h = jnp.maximum(x @ params["w1"] + params["b1"], 0.0)
    logits = h @ params["wp"] + params["bp"]
    policy = jax.nn.softmax(logits, axis=-1)
    adv = (h @ params["wa"] + params["ba"]).reshape(-1)
    return policy, adv


def reference_forward_bf16(state, params):
    """Reference emulating the kernel's bf16 storage / f32 accumulation."""
    B = state.shape[0]
    x = state.reshape(B, -1).astype(jnp.bfloat16)
    h = jnp.maximum(
        jnp.dot(x, params["w1"].astype(jnp.bfloat16),
                preferred_element_type=jnp.float32) + params["b1"], 0.0)
    hb = h.astype(jnp.bfloat16)
    logits = jnp.dot(hb, params["wp"].astype(jnp.bfloat16),
                     preferred_element_type=jnp.float32) + params["bp"]
    policy = jax.nn.softmax(logits, axis=-1)
    adv = (jnp.dot(hb, params["wa"].astype(jnp.bfloat16),
                   preferred_element_type=jnp.float32) + params["ba"]).reshape(-1)
    return policy, adv


if __name__ == "__main__":
    # small shapes consistent with the module: image state (B, C, H, W)
    B, C, H, W = 2, 4, 16, 16
    dense_size = 32
    action_size = 8
    dense_in = C * H * W

    key = jax.random.PRNGKey(0)
    k_state, k_params = jax.random.split(key)
    state = jax.random.normal(k_state, (B, C, H, W), jnp.float32)
    params = init_params(k_params, dense_in, dense_size, action_size)

    policy, adv = policy_model_forward(state, params)
    policy = jax.block_until_ready(policy)
    adv = jax.block_until_ready(adv)

    assert policy.shape == (B, action_size)
    assert adv.shape == (B,)

    # tight check against a reference with matching bf16 storage / f32 accumulate
    pol_bf, adv_bf = reference_forward_bf16(state, params)
    assert jnp.allclose(policy, pol_bf, atol=1e-2, rtol=1e-2)
    assert jnp.allclose(adv, adv_bf, atol=1e-2, rtol=1e-2)

    # loose sanity check against the pure-f32 PyTorch-semantics reference
    pol_f32, adv_f32 = reference_forward_f32(state, params)
    assert jnp.allclose(policy, pol_f32, atol=5e-2, rtol=5e-2)
    assert jnp.allclose(adv, adv_f32, atol=5e-2, rtol=5e-2)

    # probability distribution sanity (approx reciprocal -> slightly loose)
    assert jnp.allclose(jnp.sum(policy, axis=-1), 1.0, atol=5e-3)

    print("KERNEL_OK")
</pallas_src>

<mosaic_0001>
module attributes {stable_mosaic.version = 11 : i64} {
  func.func @policy_model_kernel(%arg0: i32, %arg1: memref<16x1024xbf16, #tpu.memory_space<vmem>>, %arg2: memref<1024x128xbf16, #tpu.memory_space<vmem>>, %arg3: memref<1x128xf32, #tpu.memory_space<vmem>>, %arg4: memref<128x128xbf16, #tpu.memory_space<vmem>>, %arg5: memref<1x128xf32, #tpu.memory_space<vmem>>, %arg6: memref<16x128xf32, #tpu.memory_space<vmem>>) attributes {dimension_semantics = [#tpu.dimension_semantics<parallel>], iteration_bounds = array<i64: 1>, scalar_prefetch = 0 : i64, scratch_operands = 0 : i64, tpu.core_type = #tpu.core_type<tc>, window_params = [{transform_indices = @transform_0, window_bounds = array<i64: 16, 1024>}, {pipeline_mode = #tpu.pipeline_mode<synchronous>, transform_indices = @transform_1, window_bounds = array<i64: 1024, 128>}, {pipeline_mode = #tpu.pipeline_mode<synchronous>, transform_indices = @transform_2, window_bounds = array<i64: 1, 128>}, {pipeline_mode = #tpu.pipeline_mode<synchronous>, transform_indices = @transform_3, window_bounds = array<i64: 128, 128>}, {pipeline_mode = #tpu.pipeline_mode<synchronous>, transform_indices = @transform_4, window_bounds = array<i64: 1, 128>}, {transform_indices = @transform_5, window_bounds = array<i64: 16, 128>}]} {
    %c0 = arith.constant 0 : index
    %c0_0 = arith.constant 0 : index
    %0 = vector.load %arg1[%c0, %c0_0] : memref<16x1024xbf16, #tpu.memory_space<vmem>>, vector<16x1024xbf16>
    %c0_1 = arith.constant 0 : index
    %c0_2 = arith.constant 0 : index
    %1 = vector.load %arg2[%c0_1, %c0_2] : memref<1024x128xbf16, #tpu.memory_space<vmem>>, vector<1024x128xbf16>
    %cst = arith.constant dense<0.000000e+00> : vector<16x128xf32>
    %2 = tpu.matmul %0, %1, %cst {dimension_numbers = #tpu.dot_dimension_numbers<[1], [0], [0], [1], [0, 0, 1, 1], [], []>} : vector<16x1024xbf16>, vector<1024x128xbf16>, vector<16x128xf32> -> vector<16x128xf32>
    %c0_3 = arith.constant 0 : index
    %c0_4 = arith.constant 0 : index
    %3 = vector.load %arg3[%c0_3, %c0_4] : memref<1x128xf32, #tpu.memory_space<vmem>>, vector<1x128xf32>
    %4 = vector.broadcast %3 : vector<1x128xf32> to vector<16x128xf32>
    %5 = arith.addf %2, %4 : vector<16x128xf32>
    %cst_5 = arith.constant 0.000000e+00 : f32
    %6 = vector.broadcast %cst_5 : f32 to vector<16x128xf32>
    %7 = arith.maximumf %5, %6 : vector<16x128xf32>
    %8 = arith.truncf %7 : vector<16x128xf32> to vector<16x128xbf16>
    %c0_6 = arith.constant 0 : index
    %c0_7 = arith.constant 0 : index
    %9 = vector.load %arg4[%c0_6, %c0_7] : memref<128x128xbf16, #tpu.memory_space<vmem>>, vector<128x128xbf16>
    %cst_8 = arith.constant dense<0.000000e+00> : vector<16x128xf32>
    %10 = tpu.matmul %8, %9, %cst_8 {dimension_numbers = #tpu.dot_dimension_numbers<[1], [0], [0], [1], [0, 0, 1, 1], [], []>} : vector<16x128xbf16>, vector<128x128xbf16>, vector<16x128xf32> -> vector<16x128xf32>
    %c0_9 = arith.constant 0 : index
    %c0_10 = arith.constant 0 : index
    %11 = vector.load %arg5[%c0_9, %c0_10] : memref<1x128xf32, #tpu.memory_space<vmem>>, vector<1x128xf32>
    %12 = vector.broadcast %11 : vector<1x128xf32> to vector<16x128xf32>
    %13 = arith.addf %10, %12 : vector<16x128xf32>
    %14 = tpu.iota {dimensions = array<i32: 1>} : vector<16x128xi32>
    %c8_i32 = arith.constant 8 : i32
    %15 = vector.broadcast %c8_i32 : i32 to vector<16x128xi32>
    %16 = arith.cmpi slt, %14, %15 : vector<16x128xi32>
    %cst_11 = arith.constant 0xFF800000 : f32
    %17 = vector.broadcast %cst_11 : f32 to vector<16x128xf32>
    %18 = arith.select %16, %13, %17 : vector<16x128xi1>, vector<16x128xf32>
    %cst_12 = arith.constant dense<0xFF800000> : vector<16xf32>
    %19 = vector.multi_reduction <maximumf>, %18, %cst_12 [1] : vector<16x128xf32> to vector<16xf32>
    %20 = vector.shape_cast %19 : vector<16xf32> to vector<16x1xf32>
    %21 = vector.broadcast %20 : vector<16x1xf32> to vector<16x128xf32>
    %22 = arith.subf %18, %21 : vector<16x128xf32>
    %23 = math.exp %22 : vector<16x128xf32>
    %cst_13 = arith.constant dense<0.000000e+00> : vector<16xf32>
    %24 = vector.multi_reduction <add>, %23, %cst_13 [1] : vector<16x128xf32> to vector<16xf32>
    %25 = vector.shape_cast %24 : vector<16xf32> to vector<16x1xf32>
    %26 = tpu.reciprocal %25 {approx = true} : vector<16x1xf32> -> vector<16x1xf32>
    %27 = vector.broadcast %26 : vector<16x1xf32> to vector<16x128xf32>
    %28 = arith.mulf %23, %27 : vector<16x128xf32>
    %29 = arith.select %16, %28, %13 : vector<16x128xi1>, vector<16x128xf32>
    %c0_14 = arith.constant 0 : index
    %c0_15 = arith.constant 0 : index
    %30 = vector.load %arg6[%c0_14, %c0_15] : memref<16x128xf32, #tpu.memory_space<vmem>>, vector<16x128xf32>
    tpu.vector_store %arg6[%c0_14, %c0_15], %29 {strides = array<i32>} : memref<16x128xf32, #tpu.memory_space<vmem>>, vector<16x128xf32>,
    return
  }
  func.func @transform_0(%arg0: i32) -> (i32, i32) {
    %c0_i32 = arith.constant 0 : i32
    %c0_i32_0 = arith.constant 0 : i32
    return %arg0, %c0_i32 : i32, i32
  }
  func.func @transform_1(%arg0: i32) -> (i32, i32) {
    %c0_i32 = arith.constant 0 : i32
    %c0_i32_0 = arith.constant 0 : i32
    %c0_i32_1 = arith.constant 0 : i32
    return %c0_i32, %c0_i32_0 : i32, i32
  }
  func.func @transform_2(%arg0: i32) -> (i32, i32) {
    %c0_i32 = arith.constant 0 : i32
    %c0_i32_0 = arith.constant 0 : i32
    %c0_i32_1 = arith.constant 0 : i32
    return %c0_i32, %c0_i32_0 : i32, i32
  }
  func.func @transform_3(%arg0: i32) -> (i32, i32) {
    %c0_i32 = arith.constant 0 : i32
    %c0_i32_0 = arith.constant 0 : i32
    %c0_i32_1 = arith.constant 0 : i32
    return %c0_i32, %c0_i32_0 : i32, i32
  }
  func.func @transform_4(%arg0: i32) -> (i32, i32) {
    %c0_i32 = arith.constant 0 : i32
    %c0_i32_0 = arith.constant 0 : i32
    %c0_i32_1 = arith.constant 0 : i32
    return %c0_i32, %c0_i32_0 : i32, i32
  }
  func.func @transform_5(%arg0: i32) -> (i32, i32) {
    %c0_i32 = arith.constant 0 : i32
    %c0_i32_0 = arith.constant 0 : i32
    return %arg0, %c0_i32 : i32, i32
  }
}

</mosaic_0001>

<bundles_post_ra>
// kernel: tpu_custom_call.1
= control target key start
LH: loop header
LB: loop body
LE: loop exit
PB: predicated region body
PF: predicated region fallthrough
CT: control target
= control target key end

     0   :  { %10 = vsyncpa [#allocation3], 0  ;;  %s1395_s0 = inlined_call_operand.hbm [shape: bf16[16,1024], index: 0, kind: input, shape index: {}]   ;;  %s1396_s1 = inlined_call_operand.hbm [shape: bf16[1024,128], index: 1, kind: input, shape index: {}]   ;;  %s1397_s2 = inlined_call_operand.vmem [shape: f32[1,128], index: 2, kind: input, shape index: {}]   ;;  %s1398_s3 = inlined_call_operand.hbm [shape: bf16[128,128], index: 3, kind: input, shape index: {}]   ;;  %s1399_s4 = inlined_call_operand.vmem [shape: f32[1,128], index: 4, kind: input, shape index: {}]   ;;  %s1400_s5 = inlined_call_operand.hbm [shape: f32[16,128], index: 5, kind: output, shape index: {}]  }
   0x1   :  { %11 = vsyncpa [#allocation6], 0 }
   0x2   :  { %12 = vsyncpa [#allocation4], 0  ;;  %s1331_s18 = smov [#allocation5]  }
   0x3   :  { %s30_s19 = sshll.u32 %s1331_s18, 4  ;;  %s31_s19 = int_to_ptr.vmem [resolvable:$true] %s30_s19 }
   0x4   :  { %s1253_s20 = scalar_lea.vmem %s31_s19, 8192  ;;  %p1258_p1 = scmp.lt.s32.totalorder %s31_s19, %s31_s19 }
   0x5   :  { %p1254_p0 = scmp.ne.s32.totalorder %s31_s19, %s1253_s20  ;;  %p1259_p2 = scmp.lt.s32.totalorder %s1253_s20, %s1253_s20 }
   0x7   :  { %p1260_p3 = por %p1259_p2, %p1258_p1 }
   0x9   :  { %p1261_p4 = pnand %p1260_p3, %p1254_p0 }
   0xb   :  { %1264 = shalt.err (!%p1261_p4)
}
   0xc   :  { %s1332_s21 = smov 64   ;;  %s1333_s22 = smov 4  }
   0xd   :  { %36 = dma.hbm_to_vmem [thread:$0]  %s1396_s1, 8192, %s31_s19, [#allocation6], %s1332_s21, %s1332_s21, %s1333_s22  }
   0xe   :  { %s1334_s25 = smov [#allocation2]  }
   0xf   :  { %s18_s26 = sshll.u32 %s1334_s25, 4  ;;  %s19_s26 = int_to_ptr.vmem [resolvable:$true] %s18_s26 }
  0x10   :  { %s1273_s27 = scalar_lea.vmem %s19_s26, 1024  ;;  %p1278_p6 = scmp.lt.s32.totalorder %s19_s26, %s19_s26 }
  0x11   :  { %p1274_p5 = scmp.ne.s32.totalorder %s19_s26, %s1273_s27  ;;  %p1279_p7 = scmp.lt.s32.totalorder %s1273_s27, %s1273_s27 }
  0x13   :  { %p1280_p8 = por %p1279_p7, %p1278_p6 }
  0x15   :  { %p1281_p9 = pnand %p1280_p8, %p1274_p5 }
  0x17   :  { %1284 = shalt.err (!%p1281_p9)
}
  0x18   :  { %s1335_s28 = smov 512   ;;  %s1336_s29 = smov 32  }
  0x19   :  { %24 = dma.hbm_to_vmem [thread:$0]  %s1395_s0, 1024, %s19_s26, [#allocation3], %s1335_s28, %s1335_s28, %s1336_s29  }
  0x1a   :  { %s1337_s7 = smov [#allocation7]  }
  0x1b   :  { %s44_s8 = sshll.u32 %s1337_s7, 4  ;;  %s45_s8 = int_to_ptr.vmem [resolvable:$true] %s44_s8 }
  0x1c   :  { %s1293_s1 = scalar_lea.vmem %s45_s8, 1024  ;;  %p1298_p11 = scmp.lt.s32.totalorder %s45_s8, %s45_s8 }
  0x1d   :  { %p1294_p10 = scmp.ne.s32.totalorder %s45_s8, %s1293_s1  ;;  %p1299_p12 = scmp.lt.s32.totalorder %s1293_s1, %s1293_s1 }
  0x1f   :  { %p1300_p13 = por %p1299_p12, %p1298_p11 }
  0x21   :  { %p1301_p0 = pnand %p1300_p13, %p1294_p10 }
  0x23   :  { %1304 = shalt.err (!%p1301_p0)
}
  0x24   :  { %50 = dma.hbm_to_vmem [thread:$0]  %s1398_s3, 1024, %s45_s8, [#allocation6], %s1332_s21, %s1332_s21, %s1333_s22  }
  0x25   :  { %1325 = dma.done.wait [#allocation3], 1024  }
  0x26   :  { %1326 = vsyncadd [#allocation3], 4294966272 }
  0x27   :  { %1327 = dma.done.wait [#allocation6], 9216  }
  0x28   :  { %1328 = vsyncadd [#allocation6], 4294958080  ;;  %v1165_v0 = vld [vmem:[#allocation5 + $0x78] sm:$0xff]   ;;  %v1169_v4 = vld [vmem:[#allocation5 + $0x70] sm:$0xff]   ;;  %vm1339_vm0 = vmmov 0  }
  0x29   :  { %v1166_v1 = vld [vmem:[#allocation5 + $0xf8] sm:$0xff]   ;;  %1036 = vmatprep.subr.bf16.mxu0 %v1165_v0  ;;  %v1170_v5 = vld [vmem:[#allocation5 + $0xf0] sm:$0xff]   ;;  %v1173_v8 = vld [vmem:[#allocation5 + $0x68] sm:$0xff]  }
  0x2a   :  { %v1167_v2 = vld [vmem:[#allocation5 + $0x38] sm:$0xff]   ;;  %1058 = vmatprep.subr.bf16.mxu1 %v1166_v1  ;;  %v1171_v6 = vld [vmem:[#allocation5 + $0x30] sm:$0xff]   ;;  %v1174_v9 = vld [vmem:[#allocation5 + $0xe8] sm:$0xff]  }
  0x2b   :  { %v1168_v3 = vld [vmem:[#allocation5 + $0xb8] sm:$0xff]   ;;  %1037 = vmatpush3.bf16.msra.mxu0 %v1167_v2  ;;  %v1172_v7 = vld [vmem:[#allocation5 + $0xb0] sm:$0xff]   ;;  %v1175_v10 = vld [vmem:[#allocation5 + $0x28] sm:$0xff]  }
  0x2c   :  { %1059 = vmatpush3.bf16.msra.mxu1 %v1168_v3  ;;  %1038 = vmatprep.subr.bf16.mxu0 %v1169_v4  ;;  %v1176_v11 = vld [vmem:[#allocation5 + $0xa8] sm:$0xff]   ;;  %v1177_v12 = vld [vmem:[#allocation5 + $0x60] sm:$0xff]   ;;  %v1181_v16 = vld [vmem:[#allocation5 + $0x58] sm:$0xff]  }
  0x2d   :  { %1060 = vmatprep.subr.bf16.mxu1 %v1170_v5  ;;  %v1178_v13 = vld [vmem:[#allocation5 + $0xe0] sm:$0xff]   ;;  %v1182_v17 = vld [vmem:[#allocation5 + $0xd8] sm:$0xff]   ;;  %v1185_v20 = vld [vmem:[#allocation5 + $0x50] sm:$0xff]  }
  0x2e   :  { %v1179_v14 = vld [vmem:[#allocation5 + $0x20] sm:$0xff]   ;;  %v1183_v18 = vld [vmem:[#allocation5 + $0x18] sm:$0xff]   ;;  %v1186_v21 = vld [vmem:[#allocation5 + $0xd0] sm:$0xff]  }
  0x2f   :  { %1039 = vmatpush3.bf16.msra.mxu0 %v1171_v6  ;;  %v1180_v15 = vld [vmem:[#allocation5 + $0xa0] sm:$0xff]   ;;  %v1184_v19 = vld [vmem:[#allocation5 + $0x98] sm:$0xff]   ;;  %v1187_v22 = vld [vmem:[#allocation5 + $0x10] sm:$0xff]  }
  0x30   :  { %1061 = vmatpush3.bf16.msra.mxu1 %v1172_v7  ;;  %1040 = vmatprep.subr.bf16.mxu0 %v1173_v8  ;;  %v1188_v23 = vld [vmem:[#allocation5 + $0x90] sm:$0xff]   ;;  %v1189_v24 = vld [vmem:[#allocation5 + $0x48] sm:$0xff]   ;;  %v1193_v28 = vld [vmem:[#allocation5 + $0x40] sm:$0xff]  }
  0x31   :  { %1062 = vmatprep.subr.bf16.mxu1 %v1174_v9  ;;  %v1190_v25 = vld [vmem:[#allocation5 + $0xc8] sm:$0xff]   ;;  %v1194_v29 = vld [vmem:[#allocation5 + $0xc0] sm:$0xff]   ;;  %v1197_v40 = vld [vmem:[#allocation5 + $0x178] sm:$0xff]  }
  0x32   :  { %v1191_v26 = vld [vmem:[#allocation5 + $0x8] sm:$0xff]   ;;  %v1195_v30 = vld [vmem:[#allocation5] sm:$0xff]   ;;  %v1198_v41 = vld [vmem:[#allocation5 + $0x1f8] sm:$0xff]  }
  0x33   :  { %1041 = vmatpush3.bf16.msra.mxu0 %v1175_v10  ;;  %v1192_v27 = vld [vmem:[#allocation5 + $0x88] sm:$0xff]   ;;  %v1196_v31 = vld [vmem:[#allocation5 + $0x80] sm:$0xff]   ;;  %v1199_v42 = vld [vmem:[#allocation5 + $0x138] sm:$0xff]  }
  0x34   :  { %1063 = vmatpush3.bf16.msra.mxu1 %v1176_v11  ;;  %1042 = vmatprep.subr.bf16.mxu0 %v1177_v12  ;;  %v63_v32 = vld [vmem:[#allocation2] sm:$0xff]  ;;  %v64_v34 = vld [vmem:[#allocation2 + $0x8] sm:$0xff]  ;;  %v1200_v43 = vld [vmem:[#allocation5 + $0x1b8] sm:$0xff]  }
  0x35   :  { %1064 = vmatprep.subr.bf16.mxu1 %v1178_v13  ;;  %v67_v33 = vld [vmem:[#allocation2 + $0x20] sm:$0xff]  ;;  %v68_v37 = vld [vmem:[#allocation2 + $0x28] sm:$0xff]  ;;  %v1201_v44 = vld [vmem:[#allocation5 + $0x170] sm:$0xff]  }
  0x36   :  { %v955_v35 = vcombine.low %v63_v32, %v67_v33  ;;  %v956_v36 = vcombine.high %v63_v32, %v67_v33  ;;  %v957_v38 = vcombine.low %v64_v34, %v68_v37  ;;  %v958_v39 = vcombine.high %v64_v34, %v68_v37  ;;  %v1202_v45 = vld [vmem:[#allocation5 + $0x1f0] sm:$0xff]   ;;  %v1205_v48 = vld [vmem:[#allocation5 + $0x168] sm:$0xff]   ;;  %v1209_v52 = vld [vmem:[#allocation5 + $0x160] sm:$0xff]  }
  0x37   :  { %1043 = vmatpush3.bf16.msra.mxu0 %v1179_v14  ;;  %v1203_v46 = vld [vmem:[#allocation5 + $0x130] sm:$0xff]   ;;  %v1206_v49 = vld [vmem:[#allocation5 + $0x1e8] sm:$0xff]   ;;  %v1210_v53 = vld [vmem:[#allocation5 + $0x1e0] sm:$0xff]  }
  0x38   :  { %1065 = vmatpush3.bf16.msra.mxu1 %v1180_v15  ;;  %1044 = vmatprep.subr.bf16.mxu0 %v1181_v16  ;;  %v1204_v47 = vld [vmem:[#allocation5 + $0x1b0] sm:$0xff]   ;;  %v1207_v50 = vld [vmem:[#allocation5 + $0x128] sm:$0xff]   ;;  %v1211_v54 = vld [vmem:[#allocation5 + $0x120] sm:$0xff]  }
  0x39   :  { %1066 = vmatprep.subr.bf16.mxu1 %v1182_v17  ;;  %662 = vmatprep.mubr.bf16.mxu0 %v956_v36  ;;  %v1208_v51 = vld [vmem:[#allocation5 + $0x1a8] sm:$0xff]   ;;  %v1212_v55 = vld [vmem:[#allocation5 + $0x1a0] sm:$0xff]   ;;  %v1213_v56 = vld [vmem:[#allocation5 + $0x158] sm:$0xff]   ;;  %v1338_v17 = vmov 0.0  }
  0x3a   :  { %703 = vmatprep.mubr.bf16.mxu1 %v958_v39  ;;  %v1214_v57 = vld [vmem:[#allocation5 + $0x1d8] sm:$0xff]   ;;  %v1217_v60 = vld [vmem:[#allocation5 + $0x150] sm:$0xff]   ;;  %v1221_v0 = vld [vmem:[#allocation5 + $0x148] sm:$0xff]  }
  0x3b   :  { %1045 = vmatpush3.bf16.msra.mxu0 %v1183_v18  ;;  %v1215_v58 = vld [vmem:[#allocation5 + $0x118] sm:$0xff]   ;;  %v1218_v61 = vld [vmem:[#allocation5 + $0x1d0] sm:$0xff]   ;;  %v1222_v1 = vld [vmem:[#allocation5 + $0x1c8] sm:$0xff]  }
  0x3c   :  { %1067 = vmatpush3.bf16.msra.mxu1 %v1184_v19  ;;  %1046 = vmatprep.subr.bf16.mxu0 %v1185_v20  ;;  %v1216_v59 = vld [vmem:[#allocation5 + $0x198] sm:$0xff]   ;;  %v1219_v62 = vld [vmem:[#allocation5 + $0x110] sm:$0xff]   ;;  %v1223_v2 = vld [vmem:[#allocation5 + $0x108] sm:$0xff]  }
  0x3d   :  { %1068 = vmatprep.subr.bf16.mxu1 %v1186_v21  ;;  %v1220_v63 = vld [vmem:[#allocation5 + $0x190] sm:$0xff]   ;;  %v1224_v3 = vld [vmem:[#allocation5 + $0x188] sm:$0xff]   ;;  %v1225_v4 = vld [vmem:[#allocation5 + $0x140] sm:$0xff]  }
  0x3e   :  { %v1226_v5 = vld [vmem:[#allocation5 + $0x1c0] sm:$0xff]   ;;  %v65_v8 = vld [vmem:[#allocation2 + $0x10] sm:$0xff]  ;;  %v66_v12 = vld [vmem:[#allocation2 + $0x18] sm:$0xff] }
  0x3f   :  { %1047 = vmatpush3.bf16.msra.mxu0 %v1187_v22  ;;  %v1227_v6 = vld [vmem:[#allocation5 + $0x100] sm:$0xff]   ;;  %v69_v9 = vld [vmem:[#allocation2 + $0x30] sm:$0xff]  ;;  %v70_v13 = vld [vmem:[#allocation2 + $0x38] sm:$0xff] }
  0x40   :  { %1069 = vmatpush3.bf16.msra.mxu1 %v1188_v23  ;;  %1048 = vmatprep.subr.bf16.mxu0 %v1189_v24  ;;  %v1228_v7 = vld [vmem:[#allocation5 + $0x180] sm:$0xff]   ;;  %v959_v10 = vcombine.low %v65_v8, %v69_v9  ;;  %v960_v11 = vcombine.high %v65_v8, %v69_v9  ;;  %v961_v14 = vcombine.low %v66_v12, %v70_v13  ;;  %v1229_v16 = vld [vmem:[#allocation7 + $0x38] sm:$0xff]   ;;  %v1230_v18 = vld [vmem:[#allocation7 + $0x30] sm:$0xff]  }
  0x41   :  { %1070 = vmatprep.subr.bf16.mxu1 %v1190_v25  ;;  %v962_v15 = vcombine.high %v66_v12, %v70_v13  ;;  %v1231_v19 = vld [vmem:[#allocation7 + $0x28] sm:$0xff]   ;;  %v1232_v20 = vld [vmem:[#allocation7 + $0x20] sm:$0xff]   ;;  %v1233_v21 = vld [vmem:[#allocation7 + $0x18] sm:$0xff]  }
  0x42   :  { %v1234_v22 = vld [vmem:[#allocation7 + $0x10] sm:$0xff]   ;;  %v1235_v23 = vld [vmem:[#allocation7 + $0x8] sm:$0xff]   ;;  %v1236_v24 = vld [vmem:[#allocation7] sm:$0xff]  }
  0x43   :  { %1049 = vmatpush3.bf16.msra.mxu0 %v1191_v26  ;;  %v954_v32 = vld [vmem:[%s1397_s2] ss:$0 sm:$0xff] }
  0x44   :  { %1071 = vmatpush3.bf16.msra.mxu1 %v1192_v27  ;;  %1050 = vmatprep.subr.bf16.mxu0 %v1193_v28 }
  0x45   :  { %1072 = vmatprep.subr.bf16.mxu1 %v1194_v29 }
  0x47   :  { %1051 = vmatpush3.bf16.msra.mxu0 %v1195_v30 }
  0x48   :  { %1073 = vmatpush3.bf16.msra.mxu1 %v1196_v31  ;;  %1080 = vmatprep.subr.bf16.mxu0 %v1197_v40 }
  0x49   :  { %1102 = vmatprep.subr.bf16.mxu1 %v1198_v41 }
  0x4a   :  { %663 = vmatmul.mubr.bf16.vlgmr.msra.gmra.mxu0 %v955_v35 }
  0x4b   :  { %704 = vmatmul.mubr.bf16.vlgmr.msra.gmra.mxu1 %v957_v38  ;;  %1081 = vmatpush3.bf16.msra.mxu0 %v1199_v42 }
  0x4c   :  { %1103 = vmatpush3.bf16.msra.mxu1 %v1200_v43  ;;  %1082 = vmatprep.subr.bf16.mxu0 %v1201_v44 }
  0x4d   :  { %1104 = vmatprep.subr.bf16.mxu1 %v1202_v45  ;;  %744 = vmatprep.mubr.bf16.mxu0 %v960_v11 }
  0x4e   :  { %785 = vmatprep.mubr.bf16.mxu1 %v962_v15 }
  0x4f   :  { %1083 = vmatpush3.bf16.msra.mxu0 %v1203_v46 }
  0x50   :  { %1105 = vmatpush3.bf16.msra.mxu1 %v1204_v47  ;;  %1084 = vmatprep.subr.bf16.mxu0 %v1205_v48 }
  0x51   :  { %1106 = vmatprep.subr.bf16.mxu1 %v1206_v49 }
  0x53   :  { %1085 = vmatpush3.bf16.msra.mxu0 %v1207_v50 }
  0x54   :  { %1107 = vmatpush3.bf16.msra.mxu1 %v1208_v51  ;;  %1086 = vmatprep.subr.bf16.mxu0 %v1209_v52 }
  0x55   :  { %1108 = vmatprep.subr.bf16.mxu1 %v1210_v53 }
  0x57   :  { %1087 = vmatpush3.bf16.msra.mxu0 %v1211_v54 }
  0x58   :  { %1109 = vmatpush3.bf16.msra.mxu1 %v1212_v55  ;;  %1088 = vmatprep.subr.bf16.mxu0 %v1213_v56 }
  0x59   :  { %1110 = vmatprep.subr.bf16.mxu1 %v1214_v57 }
  0x5b   :  { %1089 = vmatpush3.bf16.msra.mxu0 %v1215_v58 }
  0x5c   :  { %1111 = vmatpush3.bf16.msra.mxu1 %v1216_v59  ;;  %1090 = vmatprep.subr.bf16.mxu0 %v1217_v60 }
  0x5d   :  { %1112 = vmatprep.subr.bf16.mxu1 %v1218_v61  ;;  %v909_v61 = vlaneseq }
  0x5f   :  { %1091 = vmatpush3.bf16.msra.mxu0 %v1219_v62  ;;  %v910_v62 = vand.u32 127, %v909_v61 }
  0x60   :  { %1113 = vmatpush3.bf16.msra.mxu1 %v1220_v63  ;;  %1092 = vmatprep.subr.bf16.mxu0 %v1221_v0  ;;  %v1027_v63 = vld [vmem:[%s1399_s4] ss:$0 sm:$0xff]  ;;  %s1340_s4 = smov [#allocation8]  }
  0x61   :  { %1114 = vmatprep.subr.bf16.mxu1 %v1222_v1  ;;  %vm911_vm1 = vcmp.lt.s32.totalorder %v910_v62, 8  ;;  %s941_s12 = sshll.u32 %s1340_s4, 4  ;;  %s942_s12 = int_to_ptr.vmem [resolvable:$true] %s941_s12 }
  0x62   :  { %s1305_s13 = scalar_lea.vmem %s942_s12, 256  ;;  %p1310_p2 = scmp.lt.s32.totalorder %s942_s12, %s942_s12 }
  0x63   :  { %1093 = vmatpush3.bf16.msra.mxu0 %v1223_v2  ;;  %p1306_p1 = scmp.ne.s32.totalorder %s942_s12, %s1305_s13  ;;  %p1311_p3 = scmp.lt.s32.totalorder %s1305_s13, %s1305_s13 }
  0x64   :  { %1115 = vmatpush3.bf16.msra.mxu1 %v1224_v3  ;;  %1094 = vmatprep.subr.bf16.mxu0 %v1225_v4 }
  0x65   :  { %1116 = vmatprep.subr.bf16.mxu1 %v1226_v5  ;;  %p1312_p4 = por %p1311_p3, %p1310_p2 }
  0x67   :  { %1095 = vmatpush3.bf16.msra.mxu0 %v1227_v6  ;;  %p1313_p5 = pnand %p1312_p4, %p1306_p1 }
  0x68   :  { %1117 = vmatpush3.bf16.msra.mxu1 %v1228_v7  ;;  %1133 = vmatprep.subr.bf16.mxu0 %v1338_v17 }
  0x6a   :  { %745 = vmatmul.mubr.bf16.vlgmr.msra.gmra.mxu0 %v959_v10 }
  0x6b   :  { %786 = vmatmul.mubr.bf16.vlgmr.msra.gmra.mxu1 %v961_v14  ;;  %1134 = vmatpush3.bf16.msra.mxu0 %v1229_v16 }
  0x6c   :  { %1135 = vmatprep.subr.bf16.mxu0 %v1338_v17  ;;  %1149 = vmatprep.mubr.msk.bf16.mxu0 %vm1339_vm0, %v1338_v17 }
  0x6f   :  { %1136 = vmatpush3.bf16.msra.mxu0 %v1230_v18 }
  0x70   :  { %1137 = vmatprep.subr.bf16.mxu0 %v1338_v17 }
  0x73   :  { %1138 = vmatpush3.bf16.msra.mxu0 %v1231_v19 }
  0x74   :  { %1139 = vmatprep.subr.bf16.mxu0 %v1338_v17 }
  0x77   :  { %1140 = vmatpush3.bf16.msra.mxu0 %v1232_v20 }
  0x78   :  { %1141 = vmatprep.subr.bf16.mxu0 %v1338_v17 }
  0x7b   :  { %1142 = vmatpush3.bf16.msra.mxu0 %v1233_v21 }
  0x7c   :  { %1143 = vmatprep.subr.bf16.mxu0 %v1338_v17 }
  0x7f   :  { %1144 = vmatpush3.bf16.msra.mxu0 %v1234_v22 }
  0x80   :  { %1145 = vmatprep.subr.bf16.mxu0 %v1338_v17 }
  0x83   :  { %1146 = vmatpush3.bf16.msra.mxu0 %v1235_v23 }
  0x84   :  { %1147 = vmatprep.subr.bf16.mxu0 %v1338_v17 }
  0x87   :  { %1148 = vmatpush3.bf16.msra.mxu0 %v1236_v24 }
 0x10a   :  { %v1052_v25 = vpop.f32.mrf.mxu0 }
 0x10b   :  { %v1074_v26 = vpop.f32.mrf.mxu1 }
 0x10c   :  { %v1053_v27 = vpop.f32.mrf.mxu0 }
 0x10d   :  { %v1075_v28 = vpop.f32.mrf.mxu1  ;;  %v1054_v30 = vadd.f32 %v1053_v27, %v1052_v25 }
 0x10e   :  { %v1055_v29 = vpop.f32.mrf.mxu0  ;;  %v1076_v35 = vadd.f32 %v1075_v28, %v1074_v26 }
 0x10f   :  { %v1077_v31 = vpop.f32.mrf.mxu1  ;;  %v665_v34 = vadd.f32 %v1054_v30, %v954_v32 }
 0x110   :  { %v1056_v33 = vpop.f32.mrf.mxu0 }
 0x111   :  { %v1057_v36 = vadd.f32 %v1056_v33, %v1055_v29  ;;  %v1078_v37 = vpop.f32.mrf.mxu1  ;;  %v706_v41 = vadd.f32 %v1076_v35, %v665_v34 }
 0x112   :  { %v1079_v46 = vadd.f32 %v1078_v37, %v1077_v31 }
 0x113   :  { %v668_v42 = vadd.f32 %v1057_v36, %v954_v32 }
 0x115   :  { %v709_v50 = vadd.f32 %v1079_v46, %v668_v42 }
 0x12a   :  { %v1096_v38 = vpop.f32.mrf.mxu0 }
 0x12b   :  { %v1118_v39 = vpop.f32.mrf.mxu1 }
 0x12c   :  { %v1097_v40 = vpop.f32.mrf.mxu0 }
 0x12d   :  { %v1098_v43 = vadd.f32 %v1097_v40, %v1096_v38  ;;  %v1119_v44 = vpop.f32.mrf.mxu1 }
 0x12e   :  { %v1099_v45 = vpop.f32.mrf.mxu0  ;;  %v1120_v51 = vadd.f32 %v1119_v44, %v1118_v39 }
 0x12f   :  { %v747_v47 = vadd.f32 %v1098_v43, %v706_v41  ;;  %v1121_v48 = vpop.f32.mrf.mxu1 }
 0x130   :  { %v1100_v49 = vpop.f32.mrf.mxu0 }
 0x131   :  { %v1101_v52 = vadd.f32 %v1100_v49, %v1099_v45  ;;  %v1122_v53 = vpop.f32.mrf.mxu1  ;;  %v788_v54 = vadd.f32 %v1120_v51, %v747_v47 }
 0x132   :  { %v1123_v56 = vadd.f32 %v1122_v53, %v1121_v48 }
 0x133   :  { %v750_v55 = vadd.f32 %v1101_v52, %v709_v50  ;;  %v794_v58 = vmax.f32 %v788_v54, 0.0 }
 0x135   :  { %v791_v57 = vadd.f32 %v1123_v56, %v750_v55 }
 0x137   :  { %v795_v59 = vmax.f32 %v791_v57, 0.0 }
 0x139   :  { %v796_v60 = vpack.c.bf16 %v795_v59, %v794_v58 }
 0x13b   :  { %1150 = vmatmul.mubr.bf16.vlgmr.msra.gmra.mxu0 %v796_v60 }
 0x1fb   :  { %v902_v0 = vpop.f32.mrf.mxu0 }
 0x1fc   :  { %v903_v1 = vadd.f32 %v1027_v63, %v902_v0 }
 0x1fd   :  { %v1151_v2 = vpop.f32.mrf.mxu0 }
 0x1fe   :  { %v912_v3 = vsel %vm911_vm1, %v903_v1, -inf }
 0x1ff   :  { %914 = vmax.xlane.f32.xlu0 %v912_v3  ;;  %v905_v4 = vpop.f32.mrf.mxu0 }
 0x200   :  { %v906_v5 = vadd.f32 %v1027_v63, %v905_v4 }
 0x201   :  { %v1152_v6 = vpop.f32.mrf.mxu0 }
 0x202   :  { %v913_v7 = vsel %vm911_vm1, %v906_v5, -inf }
 0x203   :  { %916 = vmax.xlane.f32.xlu0 %v913_v7 }
 0x288   :  { %v915_v8 = vpop.xlane.xlu0 %914 }
 0x289   :  { %v918_v9 = vsub.f32 %v912_v3, %v915_v8 }
 0x28b   :  { %v920_v10 = vmul.f32 1.442695, %v918_v9 }
 0x28c   :  { %v917_v11 = vpop.xlane.xlu0 %916 }
 0x28d   :  { %1237 = vpow2.f32 %v920_v10  ;;  %v919_v12 = vsub.f32 %v913_v7, %v917_v11 }
 0x28f   :  { %v922_v13 = vmul.f32 1.442695, %v919_v12 }
 0x291   :  { %1239 = vpow2.f32 %v922_v13 }
 0x29a   :  { %v1238_v14 = vpop.eup %1237 }
 0x29b   :  { %924 = vadd.xlane.f32.xlu1 %v1238_v14 }
 0x29e   :  { %v1240_v15 = vpop.eup %1239 }
 0x29f   :  { %926 = vadd.xlane.f32.xlu1 %v1240_v15 }
 0x324   :  { %v925_v16 = vpop.xlane.xlu1 %924 }
 0x325   :  { %1241 = vrcp.f32 %v925_v16 }
 0x328   :  { %v927_v17 = vpop.xlane.xlu1 %926 }
 0x329   :  { %1243 = vrcp.f32 %v927_v17 }
 0x332   :  { %v1242_v18 = vpop.eup %1241 }
 0x333   :  { %v930_v19 = vmul.f32 %v1242_v18, %v1238_v14 }
 0x335   :  { %v932_v20 = vsel %vm911_vm1, %v930_v19, %v903_v1 }
 0x336   :  { %v1244_v21 = vpop.eup %1243  ;;  %934 = vst [vmem:[#allocation8] sm:$0xff] %v932_v20 }
 0x337   :  { %v931_v22 = vmul.f32 %v1244_v21, %v1240_v15 }
 0x339   :  { %v933_v23 = vsel %vm911_vm1, %v931_v22, %v906_v5 }
 0x33a   :  { %935 = vst [vmem:[#allocation8 + $0x8] sm:$0xff] %v933_v23 }
 0x33b   :  { %1316 = shalt.err (!%p1313_p5)
}
 0x33c   :  { %s1341_s14 = smov 128   ;;  %s1342_s15 = smov 8  }
 0x33d   :  { %947 = dma.vmem_to_hbm [thread:$0]  %s942_s12, 256, %s1400_s5, [#allocation4], %s1341_s14, %s1341_s14, %s1342_s15  }
 0x33e   :  { %1329 = dma.done.wait [#allocation4], 256  }
 0x33f   :  { %1330 = vsyncadd [#allocation4], 4294967040 }
 0x340   :  { %951 = vsyncpa [#allocation3], 1 }
 0x341   :  { %952 = vsyncpa [#allocation6], 1 }
 0x342   :  { %953 = vsyncpa [#allocation4], 1 }

</bundles_post_ra>
